<compile_context>
chip_gen: v6e
topology: v6e:2x2x1
jax: 0.10.0
libtpu: 0.0.40
codegen_flags: <defaults>
</compile_context>

<pallas_src>
import numpy as np

import jax
import jax.numpy as jnp
from jax.experimental import pallas as pl
from jax.experimental.pallas import tpu as pltpu


def _leaky_relu(x, negative_slope=0.01):
    # torch.nn.functional.leaky_relu default negative_slope = 0.01
    return jnp.where(x > 0, x, negative_slope * x)


def _round_up(x, m):
    return ((x + m - 1) // m) * m


def alphanet_kernel(src_ref, wc_ref, bc_ref,
                    w0_ref, b0_ref, w1_ref, b1_ref, w2_ref, b2_ref,
                    r1_ref, mask_ref, p_ref,
                    out_ref):
    src = src_ref[...]                                   # (tile_t, S*F) f32

    # Conv2d(1, h0, kernel_size=(S, F)) on a (1,1,S,F) input == flattened dot.
    x = jnp.dot(src, wc_ref[...],
                preferred_element_type=jnp.float32) + bc_ref[...]   # (t, h0)

    # MLP: leaky_relu applied *before* every linear layer (as in the module).
    # Statically unrolled (3 layers) so the LLO scheduler sees the whole chain.
    for w_ref, b_ref in ((w0_ref, b0_ref), (w1_ref, b1_ref), (w2_ref, b2_ref)):
        x = _leaky_relu(x)
        x = jnp.dot(x, w_ref[...],
                    preferred_element_type=jnp.float32) + b_ref[...]

    # x: (tile_t, S-1) generated alphas -> L1 normalize per target.
    l1 = jnp.sum(jnp.abs(x), axis=-1, keepdims=True)     # (tile_t, 1)
    alpha = x * pl.reciprocal(l1, approx=False)          # (tile_t, S-1)

    # Combine: out[t, f] = sum_s alpha_full[t, s] * src[t, s*F + f]
    # with alpha_full = [1, alpha].  Implemented as matmuls against constant
    # 0/1 matrices (no lane-offset slicing):
    #   alpha_expand[t, s*F + f] = alpha_full[t, s]
    alpha_expand = jnp.dot(alpha, r1_ref[...],
                           preferred_element_type=jnp.float32) + mask_ref[...]
    weighted = alpha_expand * src                         # (tile_t, S*F)
    out_ref[...] = jnp.dot(weighted, p_ref[...],
                           preferred_element_type=jnp.float32)   # (tile_t, F)


def _combine_constants(S, F):
    """Constant 0/1 matrices for the alpha-weighted source combine."""
    SF = S * F
    # r1[a, (a+1)*F + f] = 1  -> spreads alpha[a] over feature group (a+1)
    r1 = np.zeros((S - 1, SF), np.float32)
    for a in range(S - 1):
        r1[a, (a + 1) * F:(a + 2) * F] = 1.0
    # mask: implicit weight 1 for source vector 0
    mask = np.zeros((1, SF), np.float32)
    mask[0, :F] = 1.0
    # p[s*F + f, g] = 1 if f == g  -> sums feature groups back to F columns
    p = np.zeros((SF, F), np.float32)
    eye = np.eye(F, dtype=np.float32)
    for s in range(S):
        p[s * F:(s + 1) * F, :] = eye
    return jnp.asarray(r1), jnp.asarray(mask), jnp.asarray(p)


def alphanet_forward(source_mats, params, tile_t=512):
    """source_mats: (T, S, F) f32; params: dict of pre-transposed weights."""
    T, S, F = source_mats.shape
    SF = S * F

    r1, mask, p = _combine_constants(S, F)

    # Tile size: multiple of 8 sublanes, no bigger than (padded) T.
    tile_t = max(8, min(int(tile_t), _round_up(T, 8)))
    tile_t = _round_up(tile_t, 8)
    T_pad = _round_up(T, tile_t)

    src_flat = source_mats.reshape(T, SF)
    if T_pad != T:
        src_flat = jnp.pad(src_flat, ((0, T_pad - T), (0, 0)))

    grid = (T_pad // tile_t,)

    weights = (params["wc"], params["bc"],
               params["w0"], params["b0"],
               params["w1"], params["b1"],
               params["w2"], params["b2"],
               r1, mask, p)

    def resident_spec(shape):
        # Full-array block, constant index_map: stays in VMEM across the grid.
        return pl.BlockSpec(tuple(shape), lambda i: (0, 0))

    in_specs = [pl.BlockSpec((tile_t, SF), lambda i: (i, 0))]
    in_specs += [resident_spec(w.shape) for w in weights]
    out_spec = pl.BlockSpec((tile_t, F), lambda i: (i, 0))

    # VMEM budget: double-buffered src/out tiles + resident weights + headroom.
    tile_bytes = (tile_t * SF + tile_t * F) * 4
    weight_bytes = sum(int(w.size) for w in weights) * 4
    vmem_limit = int(min(64 * 1024 * 1024,
                         max(16 * 1024 * 1024,
                             2 * tile_bytes + 2 * weight_bytes
                             + 4 * 1024 * 1024)))

    out = pl.pallas_call(
        alphanet_kernel,
        out_shape=jax.ShapeDtypeStruct((T_pad, F), jnp.float32),
        grid=grid,
        in_specs=in_specs,
        out_specs=out_spec,
        compiler_params=pltpu.CompilerParams(
            dimension_semantics=("parallel",),
            vmem_limit_bytes=vmem_limit),
    )(src_flat, *weights)

    return out[:T]


def alphanet_reference(source_mats, params):
    """Pure-JAX reference of the PyTorch forward, for validation."""
    T, S, F = source_mats.shape
    src_flat = source_mats.reshape(T, S * F)
    x = src_flat @ params["wc"] + params["bc"]
    for w, b in ((params["w0"], params["b0"]),
                 (params["w1"], params["b1"]),
                 (params["w2"], params["b2"])):
        x = _leaky_relu(x)
        x = x @ w + b
    alpha = x / jnp.sum(jnp.abs(x), axis=-1, keepdims=True)          # (T, S-1)
    alpha_full = jnp.concatenate([jnp.ones((T, 1), jnp.float32), alpha], axis=1)
    return jnp.einsum("ts,tsf->tf", alpha_full, source_mats)


def init_params(key, S, F, hdims):
    """Deterministic synthetic init matching the module's parameter shapes."""
    h0, h1, h2 = hdims
    n_alphas = S - 1
    ks = jax.random.split(key, 8)
    scale = 0.1
    # Conv2d weight (h0, 1, S, F) -> flattened & transposed to (S*F, h0).
    wc = scale * jax.random.normal(ks[0], (h0, S * F), jnp.float32)
    params = {
        "wc": wc.T,
        "bc": scale * jax.random.normal(ks[1], (1, h0), jnp.float32),
        # Linear(h0, h1): torch weight (h1, h0) -> pass as (h0, h1).
        "w0": scale * jax.random.normal(ks[2], (h0, h1), jnp.float32),
        "b0": scale * jax.random.normal(ks[3], (1, h1), jnp.float32),
        "w1": scale * jax.random.normal(ks[4], (h1, h2), jnp.float32),
        "b1": scale * jax.random.normal(ks[5], (1, h2), jnp.float32),
        "w2": scale * jax.random.normal(ks[6], (h2, n_alphas), jnp.float32),
        "b2": scale * jax.random.normal(ks[7], (1, n_alphas), jnp.float32),
    }
    return params


if __name__ == "__main__":
    # Small shapes: 100 targets (not a multiple of the tile -> exercises the
    # padding path), 4 source vectors per target, 16 features, hdims = (32,
    # 32, 32) as in the module defaults.  tile_t=32 gives a 4-step grid so the
    # pipelined path is actually exercised; production use keeps the default
    # tile_t=512.
    T, S, F = 100, 4, 16
    hdims = (32, 32, 32)

    key = jax.random.PRNGKey(0)
    k_src, k_par = jax.random.split(key)
    source_mats = jax.random.normal(k_src, (T, S, F), jnp.float32)
    params = init_params(k_par, S, F, hdims)

    out = alphanet_forward(source_mats, params, tile_t=32)
    out = jax.block_until_ready(out)

    ref = alphanet_reference(source_mats, params)
    assert out.shape == (T, F)
    assert jnp.all(jnp.isfinite(out))
    assert jnp.allclose(out, ref, rtol=1e-3, atol=1e-3), (out, ref)

    print("KERNEL_OK")
</pallas_src>

<mosaic_0001>
module attributes {stable_mosaic.version = 11 : i64} {
  func.func @alphanet_kernel(%arg0: i32, %arg1: memref<32x64xf32, #tpu.memory_space<vmem>>, %arg2: memref<64x32xf32, #tpu.memory_space<vmem>>, %arg3: memref<1x32xf32, #tpu.memory_space<vmem>>, %arg4: memref<32x32xf32, #tpu.memory_space<vmem>>, %arg5: memref<1x32xf32, #tpu.memory_space<vmem>>, %arg6: memref<32x32xf32, #tpu.memory_space<vmem>>, %arg7: memref<1x32xf32, #tpu.memory_space<vmem>>, %arg8: memref<32x3xf32, #tpu.memory_space<vmem>>, %arg9: memref<1x3xf32, #tpu.memory_space<vmem>>, %arg10: memref<3x64xf32, #tpu.memory_space<vmem>>, %arg11: memref<1x64xf32, #tpu.memory_space<vmem>>, %arg12: memref<64x16xf32, #tpu.memory_space<vmem>>, %arg13: memref<32x16xf32, #tpu.memory_space<vmem>>) attributes {dimension_semantics = [#tpu.dimension_semantics<parallel>], iteration_bounds = array<i64: 4>, scalar_prefetch = 0 : i64, scratch_operands = 0 : i64, tpu.core_type = #tpu.core_type<tc>, window_params = [{transform_indices = @transform_0, window_bounds = array<i64: 32, 64>}, {pipeline_mode = #tpu.pipeline_mode<synchronous>, transform_indices = @transform_1, window_bounds = array<i64: 64, 32>}, {pipeline_mode = #tpu.pipeline_mode<synchronous>, transform_indices = @transform_2, window_bounds = array<i64: 1, 32>}, {pipeline_mode = #tpu.pipeline_mode<synchronous>, transform_indices = @transform_3, window_bounds = array<i64: 32, 32>}, {pipeline_mode = #tpu.pipeline_mode<synchronous>, transform_indices = @transform_4, window_bounds = array<i64: 1, 32>}, {pipeline_mode = #tpu.pipeline_mode<synchronous>, transform_indices = @transform_5, window_bounds = array<i64: 32, 32>}, {pipeline_mode = #tpu.pipeline_mode<synchronous>, transform_indices = @transform_6, window_bounds = array<i64: 1, 32>}, {pipeline_mode = #tpu.pipeline_mode<synchronous>, transform_indices = @transform_7, window_bounds = array<i64: 32, 3>}, {pipeline_mode = #tpu.pipeline_mode<synchronous>, transform_indices = @transform_8, window_bounds = array<i64: 1, 3>}, {pipeline_mode = #tpu.pipeline_mode<synchronous>, transform_indices = @transform_9, window_bounds = array<i64: 3, 64>}, {pipeline_mode = #tpu.pipeline_mode<synchronous>, transform_indices = @transform_10, window_bounds = array<i64: 1, 64>}, {pipeline_mode = #tpu.pipeline_mode<synchronous>, transform_indices = @transform_11, window_bounds = array<i64: 64, 16>}, {transform_indices = @transform_12, window_bounds = array<i64: 32, 16>}]} {
    %c0 = arith.constant 0 : index
    %c0_0 = arith.constant 0 : index
    %0 = vector.load %arg1[%c0, %c0_0] : memref<32x64xf32, #tpu.memory_space<vmem>>, vector<32x64xf32>
    %c0_1 = arith.constant 0 : index
    %c0_2 = arith.constant 0 : index
    %1 = vector.load %arg2[%c0_1, %c0_2] : memref<64x32xf32, #tpu.memory_space<vmem>>, vector<64x32xf32>
    %cst = arith.constant dense<0.000000e+00> : vector<32x32xf32>
    %2 = tpu.matmul %0, %1, %cst {dimension_numbers = #tpu.dot_dimension_numbers<[1], [0], [0], [1], [0, 0, 1, 1], [], []>} : vector<32x64xf32>, vector<64x32xf32>, vector<32x32xf32> -> vector<32x32xf32>
    %c0_3 = arith.constant 0 : index
    %c0_4 = arith.constant 0 : index
    %3 = vector.load %arg3[%c0_3, %c0_4] : memref<1x32xf32, #tpu.memory_space<vmem>>, vector<1x32xf32>
    %4 = vector.broadcast %3 : vector<1x32xf32> to vector<32x32xf32>
    %5 = arith.addf %2, %4 : vector<32x32xf32>
    %cst_5 = arith.constant 0.000000e+00 : f32
    %6 = vector.broadcast %cst_5 : f32 to vector<32x32xf32>
    %7 = arith.cmpf ogt, %5, %6 : vector<32x32xf32>
    %cst_6 = arith.constant 0.00999999977 : f32
    %8 = vector.broadcast %cst_6 : f32 to vector<32x32xf32>
    %9 = arith.mulf %8, %5 : vector<32x32xf32>
    %10 = arith.select %7, %5, %9 : vector<32x32xi1>, vector<32x32xf32>
    %c0_7 = arith.constant 0 : index
    %c0_8 = arith.constant 0 : index
    %11 = vector.load %arg4[%c0_7, %c0_8] : memref<32x32xf32, #tpu.memory_space<vmem>>, vector<32x32xf32>
    %cst_9 = arith.constant dense<0.000000e+00> : vector<32x32xf32>
    %12 = tpu.matmul %10, %11, %cst_9 {dimension_numbers = #tpu.dot_dimension_numbers<[1], [0], [0], [1], [0, 0, 1, 1], [], []>} : vector<32x32xf32>, vector<32x32xf32>, vector<32x32xf32> -> vector<32x32xf32>
    %c0_10 = arith.constant 0 : index
    %c0_11 = arith.constant 0 : index
    %13 = vector.load %arg5[%c0_10, %c0_11] : memref<1x32xf32, #tpu.memory_space<vmem>>, vector<1x32xf32>
    %14 = vector.broadcast %13 : vector<1x32xf32> to vector<32x32xf32>
    %15 = arith.addf %12, %14 : vector<32x32xf32>
    %cst_12 = arith.constant 0.000000e+00 : f32
    %16 = vector.broadcast %cst_12 : f32 to vector<32x32xf32>
    %17 = arith.cmpf ogt, %15, %16 : vector<32x32xf32>
    %cst_13 = arith.constant 0.00999999977 : f32
    %18 = vector.broadcast %cst_13 : f32 to vector<32x32xf32>
    %19 = arith.mulf %18, %15 : vector<32x32xf32>
    %20 = arith.select %17, %15, %19 : vector<32x32xi1>, vector<32x32xf32>
    %c0_14 = arith.constant 0 : index
    %c0_15 = arith.constant 0 : index
    %21 = vector.load %arg6[%c0_14, %c0_15] : memref<32x32xf32, #tpu.memory_space<vmem>>, vector<32x32xf32>
    %cst_16 = arith.constant dense<0.000000e+00> : vector<32x32xf32>
    %22 = tpu.matmul %20, %21, %cst_16 {dimension_numbers = #tpu.dot_dimension_numbers<[1], [0], [0], [1], [0, 0, 1, 1], [], []>} : vector<32x32xf32>, vector<32x32xf32>, vector<32x32xf32> -> vector<32x32xf32>
    %c0_17 = arith.constant 0 : index
    %c0_18 = arith.constant 0 : index
    %23 = vector.load %arg7[%c0_17, %c0_18] : memref<1x32xf32, #tpu.memory_space<vmem>>, vector<1x32xf32>
    %24 = vector.broadcast %23 : vector<1x32xf32> to vector<32x32xf32>
    %25 = arith.addf %22, %24 : vector<32x32xf32>
    %cst_19 = arith.constant 0.000000e+00 : f32
    %26 = vector.broadcast %cst_19 : f32 to vector<32x32xf32>
    %27 = arith.cmpf ogt, %25, %26 : vector<32x32xf32>
    %cst_20 = arith.constant 0.00999999977 : f32
    %28 = vector.broadcast %cst_20 : f32 to vector<32x32xf32>
    %29 = arith.mulf %28, %25 : vector<32x32xf32>
    %30 = arith.select %27, %25, %29 : vector<32x32xi1>, vector<32x32xf32>
    %c0_21 = arith.constant 0 : index
    %c0_22 = arith.constant 0 : index
    %31 = vector.load %arg8[%c0_21, %c0_22] : memref<32x3xf32, #tpu.memory_space<vmem>>, vector<32x3xf32>
    %cst_23 = arith.constant dense<0.000000e+00> : vector<32x3xf32>
    %32 = tpu.matmul %30, %31, %cst_23 {dimension_numbers = #tpu.dot_dimension_numbers<[1], [0], [0], [1], [0, 0, 1, 1], [], []>} : vector<32x32xf32>, vector<32x3xf32>, vector<32x3xf32> -> vector<32x3xf32>
    %c0_24 = arith.constant 0 : index
    %c0_25 = arith.constant 0 : index
    %33 = vector.load %arg9[%c0_24, %c0_25] : memref<1x3xf32, #tpu.memory_space<vmem>>, vector<1x3xf32>
    %34 = vector.broadcast %33 : vector<1x3xf32> to vector<32x3xf32>
    %35 = arith.addf %32, %34 : vector<32x3xf32>
    %36 = math.absf %35 : vector<32x3xf32>
    %cst_26 = arith.constant dense<0.000000e+00> : vector<32xf32>
    %37 = vector.multi_reduction <add>, %36, %cst_26 [1] : vector<32x3xf32> to vector<32xf32>
    %38 = vector.shape_cast %37 : vector<32xf32> to vector<32x1xf32>
    %39 = tpu.reciprocal %38 : vector<32x1xf32> -> vector<32x1xf32>
    %40 = vector.broadcast %39 : vector<32x1xf32> to vector<32x3xf32>
    %41 = arith.mulf %35, %40 : vector<32x3xf32>
    %c0_27 = arith.constant 0 : index
    %c0_28 = arith.constant 0 : index
    %42 = vector.load %arg10[%c0_27, %c0_28] : memref<3x64xf32, #tpu.memory_space<vmem>>, vector<3x64xf32>
    %cst_29 = arith.constant dense<0.000000e+00> : vector<32x64xf32>
    %43 = tpu.matmul %41, %42, %cst_29 {dimension_numbers = #tpu.dot_dimension_numbers<[1], [0], [0], [1], [0, 0, 1, 1], [], []>} : vector<32x3xf32>, vector<3x64xf32>, vector<32x64xf32> -> vector<32x64xf32>
    %c0_30 = arith.constant 0 : index
    %c0_31 = arith.constant 0 : index
    %44 = vector.load %arg11[%c0_30, %c0_31] : memref<1x64xf32, #tpu.memory_space<vmem>>, vector<1x64xf32>
    %45 = vector.broadcast %44 : vector<1x64xf32> to vector<32x64xf32>
    %46 = arith.addf %43, %45 : vector<32x64xf32>
    %47 = arith.mulf %46, %0 : vector<32x64xf32>
    %c0_32 = arith.constant 0 : index
    %c0_33 = arith.constant 0 : index
    %48 = vector.load %arg12[%c0_32, %c0_33] : memref<64x16xf32, #tpu.memory_space<vmem>>, vector<64x16xf32>
    %cst_34 = arith.constant dense<0.000000e+00> : vector<32x16xf32>
    %49 = tpu.matmul %47, %48, %cst_34 {dimension_numbers = #tpu.dot_dimension_numbers<[1], [0], [0], [1], [0, 0, 1, 1], [], []>} : vector<32x64xf32>, vector<64x16xf32>, vector<32x16xf32> -> vector<32x16xf32>
    %c0_35 = arith.constant 0 : index
    %c0_36 = arith.constant 0 : index
    %50 = vector.load %arg13[%c0_35, %c0_36] : memref<32x16xf32, #tpu.memory_space<vmem>>, vector<32x16xf32>
    tpu.vector_store %arg13[%c0_35, %c0_36], %49 {strides = array<i32>} : memref<32x16xf32, #tpu.memory_space<vmem>>, vector<32x16xf32>,
    return
  }
  func.func @transform_0(%arg0: i32) -> (i32, i32) {
    %c0_i32 = arith.constant 0 : i32
    %c0_i32_0 = arith.constant 0 : i32
    return %arg0, %c0_i32 : i32, i32
  }
  func.func @transform_1(%arg0: i32) -> (i32, i32) {
    %c0_i32 = arith.constant 0 : i32
    %c0_i32_0 = arith.constant 0 : i32
    %c0_i32_1 = arith.constant 0 : i32
    return %c0_i32, %c0_i32_0 : i32, i32
  }
  func.func @transform_2(%arg0: i32) -> (i32, i32) {
    %c0_i32 = arith.constant 0 : i32
    %c0_i32_0 = arith.constant 0 : i32
    %c0_i32_1 = arith.constant 0 : i32
    return %c0_i32, %c0_i32_0 : i32, i32
  }
  func.func @transform_3(%arg0: i32) -> (i32, i32) {
    %c0_i32 = arith.constant 0 : i32
    %c0_i32_0 = arith.constant 0 : i32
    %c0_i32_1 = arith.constant 0 : i32
    return %c0_i32, %c0_i32_0 : i32, i32
  }
  func.func @transform_4(%arg0: i32) -> (i32, i32) {
    %c0_i32 = arith.constant 0 : i32
    %c0_i32_0 = arith.constant 0 : i32
    %c0_i32_1 = arith.constant 0 : i32
    return %c0_i32, %c0_i32_0 : i32, i32
  }
  func.func @transform_5(%arg0: i32) -> (i32, i32) {
    %c0_i32 = arith.constant 0 : i32
    %c0_i32_0 = arith.constant 0 : i32
    %c0_i32_1 = arith.constant 0 : i32
    return %c0_i32, %c0_i32_0 : i32, i32
  }
  func.func @transform_6(%arg0: i32) -> (i32, i32) {
    %c0_i32 = arith.constant 0 : i32
    %c0_i32_0 = arith.constant 0 : i32
    %c0_i32_1 = arith.constant 0 : i32
    return %c0_i32, %c0_i32_0 : i32, i32
  }
  func.func @transform_7(%arg0: i32) -> (i32, i32) {
    %c0_i32 = arith.constant 0 : i32
    %c0_i32_0 = arith.constant 0 : i32
    %c0_i32_1 = arith.constant 0 : i32
    return %c0_i32, %c0_i32_0 : i32, i32
  }
  func.func @transform_8(%arg0: i32) -> (i32, i32) {
    %c0_i32 = arith.constant 0 : i32
    %c0_i32_0 = arith.constant 0 : i32
    %c0_i32_1 = arith.constant 0 : i32
    return %c0_i32, %c0_i32_0 : i32, i32
  }
  func.func @transform_9(%arg0: i32) -> (i32, i32) {
    %c0_i32 = arith.constant 0 : i32
    %c0_i32_0 = arith.constant 0 : i32
    %c0_i32_1 = arith.constant 0 : i32
    return %c0_i32, %c0_i32_0 : i32, i32
  }
  func.func @transform_10(%arg0: i32) -> (i32, i32) {
    %c0_i32 = arith.constant 0 : i32
    %c0_i32_0 = arith.constant 0 : i32
    %c0_i32_1 = arith.constant 0 : i32
    return %c0_i32, %c0_i32_0 : i32, i32
  }
  func.func @transform_11(%arg0: i32) -> (i32, i32) {
    %c0_i32 = arith.constant 0 : i32
    %c0_i32_0 = arith.constant 0 : i32
    %c0_i32_1 = arith.constant 0 : i32
    return %c0_i32, %c0_i32_0 : i32, i32
  }
  func.func @transform_12(%arg0: i32) -> (i32, i32) {
    %c0_i32 = arith.constant 0 : i32
    %c0_i32_0 = arith.constant 0 : i32
    return %arg0, %c0_i32 : i32, i32
  }
}

</mosaic_0001>

<bundles_post_ra>
// kernel: tpu_custom_call.1
= control target key start
LH: loop header
LB: loop body
LE: loop exit
PB: predicated region body
PF: predicated region fallthrough
CT: control target
= control target key end

     0   :  { %s1476_s21 = smov 0   ;;  %s1646_s0 = inlined_call_operand.vmem [shape: f32[128,64], index: 0, kind: input, shape index: {}]   ;;  %s1647_s1 = inlined_call_operand.vmem [shape: f32[64,32], index: 1, kind: input, shape index: {}]   ;;  %s1648_s2 = inlined_call_operand.vmem [shape: f32[1,32], index: 2, kind: input, shape index: {}]   ;;  %s1649_s3 = inlined_call_operand.vmem [shape: f32[32,32], index: 3, kind: input, shape index: {}]   ;;  %s1650_s4 = inlined_call_operand.vmem [shape: f32[1,32], index: 4, kind: input, shape index: {}]   ;;  %s1651_s5 = inlined_call_operand.vmem [shape: f32[32,32], index: 5, kind: input, shape index: {}]   ;;  %s1652_s6 = inlined_call_operand.vmem [shape: f32[1,32], index: 6, kind: input, shape index: {}]   ;;  %s1653_s7 = inlined_call_operand.vmem [shape: f32[32,3], index: 7, kind: input, shape index: {}]   ;;  %s1654_s8 = inlined_call_operand.vmem [shape: f32[1,3], index: 8, kind: input, shape index: {}]   ;;  %s1655_s9 = inlined_call_operand.vmem [shape: f32[3,64], index: 9, kind: input, shape index: {}]   ;;  %s1656_s10 = inlined_call_operand.vmem [shape: f32[1,64], index: 10, kind: input, shape index: {}]   ;;  %s1657_s11 = inlined_call_operand.vmem [shape: f32[64,16], index: 11, kind: input, shape index: {}]   ;;  %s1658_s12 = inlined_call_operand.vmem [shape: f32[128,16], index: 12, kind: output, shape index: {}]  }
   0x1 LB: > { %s1199_s22 = sadd.s32 4294967295, %s1409_s21   ;;  %p1203_p0 = scmp.ge.s32.totalorder %s1409_s21, 1  ;;  %s1409_s21 = sphi %s1476_s21, %s22_s21  }
   0x2   : > { %p363_p1 = scmp.lt.s32.totalorder %s1409_s21, 5 }
   0x4   : > { %p364_p2 = pnand %p1203_p0, %p363_p1 }
   0x5   : > { %s1204_s27 = sshll.u32 (!%p364_p2), %s1199_s22, 2 }
   0x6   : > { %367 = sbr.rel (%p364_p2) target bundleno = 1390 (0x56e), region = 68  ;;  %p406_p3 = scmp.lt.s32.totalorder (!%p364_p2), %s1204_s27, 15 }
   0xb   : > { %v428_v0 = vld [vmem:[%s1647_s1 + $0x38] sm:$0xff]  ;;  %v427_v1 = vld [vmem:[%s1647_s1 + $0x30] sm:$0xff]  ;;  %v426_v2 = vld [vmem:[%s1647_s1 + $0x28] sm:$0xff]  ;;  %s1660_s27 = smov (!%p406_p3, %s1204_s27), 15  ;;  %vm436_vm0 = vcmask 523264   ;;  %vm557_vm1 = vcmask 261120  }
   0xc   : > { %1293 = vmatprep.subr.mxu0 %v428_v0  ;;  %v425_v3 = vld [vmem:[%s1647_s1 + $0x20] sm:$0xff]  ;;  %s1205_s14 = sshll.u32 %s1660_s27, 3  ;;  %v424_v4 = vld [vmem:[%s1647_s1 + $0x18] sm:$0xff]  ;;  %v423_v6 = vld [vmem:[%s1647_s1 + $0x10] sm:$0xff]  ;;  %vm899_vm14 = vcmask 23552   ;;  %vm940_vm15 = vcmask 1042432  }
   0xd   : > { %1294 = vmatpush3.msra.mxu0 %v428_v0  ;;  %s409_s19 = scalar_lea.vmem %s1646_s0, %s1205_s14  ;;  %v422_v7 = vld [vmem:[%s1647_s1 + $0x8] sm:$0xff]  ;;  %v421_v8 = vld [vmem:[%s1647_s1] sm:$0xff]  ;;  %v549_v12 = vld [vmem:[%s1649_s3 + $0x18] sm:$0xff]  ;;  %s415_s20 = scalar_lea.vmem %s1658_s12, %s1205_s14 }
   0xe   : > { %1295 = vmatprep.subr.mxu0 %v427_v1  ;;  %v1507_v5 = vld [vmem:[%s409_s19] sm:$0xff]  ;;  %v1520_v9 = vld [vmem:[%s409_s19 + $0x8] sm:$0xff]  ;;  %v1522_v10 = vld [vmem:[%s409_s19 + $0x10] sm:$0xff]  ;;  %1315 = vmatprep.subr.mxu1 %v549_v12 }
   0xf   : > { %1296 = vmatpush3.msra.mxu0 %v427_v1  ;;  %1309 = vmatprep.mubr.msk.f32.mxu0 %vm436_vm0, %v1507_v5  ;;  %v1528_v11 = vld [vmem:[%s409_s19 + $0x18] sm:$0xff]  ;;  %v548_v13 = vld [vmem:[%s1649_s3 + $0x10] sm:$0xff]  ;;  %v547_v14 = vld [vmem:[%s1649_s3 + $0x8] sm:$0xff] }
  0x10   : > { %1297 = vmatprep.subr.mxu0 %v426_v2  ;;  %1316 = vmatpush3.msra.mxu1 %v549_v12  ;;  %v546_v15 = vld [vmem:[%s1649_s3] sm:$0xff]  ;;  %v670_v33 = vld [vmem:[%s1651_s5 + $0x18] sm:$0xff]  ;;  %v669_v34 = vld [vmem:[%s1651_s5 + $0x10] sm:$0xff] }
  0x11   : > { %1298 = vmatpush3.msra.mxu0 %v426_v2  ;;  %1317 = vmatprep.subr.mxu1 %v548_v13  ;;  %v1208_v16 = vld [vmem:[%s1648_s2] ss:$0 sm:$0xff]  ;;  %v668_v35 = vld [vmem:[%s1651_s5 + $0x8] sm:$0xff]  ;;  %v790_v54 = vld [vmem:[%s1653_s7 + $0x18] sm:$0xff] }
  0x12   : > { %1299 = vmatprep.subr.mxu0 %v425_v3  ;;  %1318 = vmatpush3.msra.mxu1 %v548_v13  ;;  %v667_v36 = vld [vmem:[%s1651_s5] sm:$0xff]  ;;  %v789_v55 = vld [vmem:[%s1653_s7 + $0x10] sm:$0xff]  ;;  %v788_v56 = vld [vmem:[%s1653_s7 + $0x8] sm:$0xff] }
  0x13   : > { %1300 = vmatpush3.msra.mxu0 %v425_v3  ;;  %1319 = vmatprep.subr.mxu1 %v547_v14  ;;  %v1213_v37 = vld [vmem:[%s1650_s4] ss:$0 sm:$0xff] }
  0x14   : > { %1301 = vmatprep.subr.mxu0 %v424_v4  ;;  %1320 = vmatpush3.msra.mxu1 %v547_v14  ;;  %v787_v57 = vld [vmem:[%s1653_s7] sm:$0xff] }
  0x15   : > { %1302 = vmatpush3.msra.mxu0 %v424_v4  ;;  %1321 = vmatprep.subr.mxu1 %v546_v15  ;;  %v1218_v58 = vld [vmem:[%s1652_s6] ss:$0 sm:$0xff] }
  0x16   : > { %1303 = vmatprep.subr.mxu0 %v423_v6  ;;  %1322 = vmatpush3.msra.mxu1 %v546_v15 }
  0x17   : > { %1304 = vmatpush3.msra.mxu0 %v423_v6  ;;  %1329 = vmatprep.subr.mxu1 %v670_v33 }
  0x18   : > { %1305 = vmatprep.subr.mxu0 %v422_v7 }
  0x19   : > { %1306 = vmatpush3.msra.mxu0 %v422_v7 }
  0x1a   : > { %1307 = vmatprep.subr.mxu0 %v421_v8 }
  0x1b   : > { %1308 = vmatpush3.msra.mxu0 %v421_v8 }
  0x1c   : > { %1310 = vmatmul.mubr.msk.f32.vlgmr.msra.gmra.mxu0 %vm436_vm0, %v1520_v9 }
  0x1d   : > { %1312 = vmatprep.mubr.msk.f32.mxu0 %vm436_vm0, %v1522_v10 }
  0x20   : > { %1313 = vmatmul.mubr.msk.f32.gmra.mxu0 %vm436_vm0, %v1528_v11 }
  0xdc   : > { %v1311_v17 = vpop.f32.mrf.mxu0 }
  0xdd   : > { %v521_v18 = vadd.f32 %v1311_v17, %v1208_v16 }
  0xde   : > { %v515_v19 = vpop.f32.mrf.mxu0 }
  0xdf   : > { %v516_v20 = vadd.f32 %v1208_v16, %v515_v19  ;;  %v539_v21 = vmul.f32 0.01, %v521_v18  ;;  %vm535_vm2 = vcmp.gt.f32.partialorder %v521_v18, 0.0 }
  0xe0   : > { %v1314_v22 = vpop.f32.mrf.mxu0 }
  0xe1   : > { %v531_v23 = vadd.f32 %v1314_v22, %v1208_v16  ;;  %vm534_vm3 = vcmp.gt.f32.partialorder %v516_v20, 0.0  ;;  %v538_v24 = vmul.f32 0.01, %v516_v20  ;;  %v543_v29 = vsel %vm535_vm2, %v521_v18, %v539_v21 }
  0xe2   : > { %v525_v25 = vpop.f32.mrf.mxu0 }
  0xe3   : > { %v526_v26 = vadd.f32 %v1208_v16, %v525_v25  ;;  %v542_v27 = vsel %vm534_vm3, %v516_v20, %v538_v24  ;;  %v541_v28 = vmul.f32 0.01, %v531_v23  ;;  %vm537_vm4 = vcmp.gt.f32.partialorder %v531_v23, 0.0  ;;  %v1223_v16 = vld [vmem:[%s1654_s8] ss:$0 sm:$0xff] }
  0xe4   : > { %1323 = vmatprep.mubr.msk.f32.mxu1 %vm557_vm1, %v542_v27 }
  0xe5   : > { %vm536_vm5 = vcmp.gt.f32.partialorder %v526_v26, 0.0  ;;  %v540_v30 = vmul.f32 0.01, %v526_v26  ;;  %1324 = vmatmul.mubr.msk.f32.vlgmr.msra.gmra.mxu1 %vm557_vm1, %v543_v29  ;;  %v545_v32 = vsel %vm537_vm4, %v531_v23, %v541_v28 }
  0xe6   : > { %1330 = vmatpush3.msra.mxu1 %v670_v33  ;;  %v1040_v33 = vld [vmem:[%s1657_s11 + $0x38] sm:$0xff] }
  0xe7   : > { %v544_v31 = vsel %vm536_vm5, %v526_v26, %v540_v30  ;;  %1331 = vmatprep.subr.mxu1 %v669_v34  ;;  %1365 = vmatprep.subr.mxu0 %v1040_v33 }
  0xe8   : > { %1326 = vmatprep.mubr.msk.f32.mxu1 %vm557_vm1, %v544_v31  ;;  %1332 = vmatpush3.msra.mxu1 %v669_v34  ;;  %v1039_v34 = vld [vmem:[%s1657_s11 + $0x30] sm:$0xff] }
  0xe9   : > { %1327 = vmatmul.mubr.msk.f32.gmra.mxu1 %vm557_vm1, %v545_v32  ;;  %1333 = vmatprep.subr.mxu1 %v668_v35  ;;  %v920_v32 = vld [vmem:[%s1655_s9] sm:$0x7] }
  0xea   : > { %1334 = vmatpush3.msra.mxu1 %v668_v35  ;;  %1366 = vmatpush3.msra.mxu0 %v1040_v33  ;;  %v1038_v35 = vld [vmem:[%s1657_s11 + $0x28] sm:$0xff] }
  0xeb   : > { %1335 = vmatprep.subr.mxu1 %v667_v36  ;;  %1367 = vmatprep.subr.mxu0 %v1039_v34 }
  0xec   : > { %1336 = vmatpush3.msra.mxu1 %v667_v36  ;;  %1368 = vmatpush3.msra.mxu0 %v1039_v34  ;;  %v1037_v36 = vld [vmem:[%s1657_s11 + $0x20] sm:$0xff] }
  0xed   : > { %1343 = vmatprep.subr.mxu1 %v790_v54  ;;  %1369 = vmatprep.subr.mxu0 %v1038_v35 }
  0xee   : > { %1370 = vmatpush3.msra.mxu0 %v1038_v35 }
  0xef   : > { %1371 = vmatprep.subr.mxu0 %v1037_v36 }
  0xf0   : > { %1372 = vmatpush3.msra.mxu0 %v1037_v36 }
 0x1a5   : > { %v1325_v38 = vpop.f32.mrf.mxu1 }
 0x1a6   : > { %v642_v39 = vadd.f32 %v1325_v38, %v1213_v37 }
 0x1a7   : > { %v636_v40 = vpop.f32.mrf.mxu1 }
 0x1a8   : > { %v637_v41 = vadd.f32 %v1213_v37, %v636_v40  ;;  %v660_v42 = vmul.f32 0.01, %v642_v39  ;;  %vm656_vm6 = vcmp.gt.f32.partialorder %v642_v39, 0.0 }
 0x1a9   : > { %v1328_v43 = vpop.f32.mrf.mxu1 }
 0x1aa   : > { %vm655_vm7 = vcmp.gt.f32.partialorder %v637_v41, 0.0  ;;  %v659_v44 = vmul.f32 0.01, %v637_v41  ;;  %v652_v45 = vadd.f32 %v1328_v43, %v1213_v37  ;;  %v664_v49 = vsel %vm656_vm6, %v642_v39, %v660_v42 }
 0x1ab   : > { %v646_v46 = vpop.f32.mrf.mxu1 }
 0x1ac   : > { %v647_v47 = vadd.f32 %v1213_v37, %v646_v46  ;;  %v663_v48 = vsel %vm655_vm7, %v637_v41, %v659_v44  ;;  %v662_v50 = vmul.f32 0.01, %v652_v45  ;;  %vm658_vm8 = vcmp.gt.f32.partialorder %v652_v45, 0.0 }
 0x1ad   : > { %1337 = vmatprep.mubr.msk.f32.mxu1 %vm557_vm1, %v663_v48 }
 0x1ae   : > { %vm657_vm9 = vcmp.gt.f32.partialorder %v647_v47, 0.0  ;;  %v661_v51 = vmul.f32 0.01, %v647_v47  ;;  %1338 = vmatmul.mubr.msk.f32.vlgmr.msra.gmra.mxu1 %vm557_vm1, %v664_v49  ;;  %v666_v53 = vsel %vm658_vm8, %v652_v45, %v662_v50  ;;  %v1036_v49 = vld [vmem:[%s1657_s11 + $0x18] sm:$0xff]  ;;  %v1035_v50 = vld [vmem:[%s1657_s11 + $0x10] sm:$0xff] }
 0x1af   : > { %1344 = vmatpush3.msra.mxu1 %v790_v54  ;;  %1373 = vmatprep.subr.mxu0 %v1036_v49 }
 0x1b0   : > { %v665_v52 = vsel %vm657_vm9, %v647_v47, %v661_v51  ;;  %1345 = vmatprep.subr.mxu1 %v789_v55  ;;  %1374 = vmatpush3.msra.mxu0 %v1036_v49  ;;  %v1034_v51 = vld [vmem:[%s1657_s11 + $0x8] sm:$0xff] }
 0x1b1   : > { %1340 = vmatprep.mubr.msk.f32.mxu1 %vm557_vm1, %v665_v52  ;;  %1346 = vmatpush3.msra.mxu1 %v789_v55  ;;  %v1033_v52 = vld [vmem:[%s1657_s11] sm:$0xff] }
 0x1b2   : > { %1341 = vmatmul.mubr.msk.f32.gmra.mxu1 %vm557_vm1, %v666_v53  ;;  %1347 = vmatprep.subr.mxu1 %v788_v56  ;;  %v1228_v53 = vld [vmem:[%s1656_s10] ss:$0 sm:$0xff] }
 0x1b3   : > { %1348 = vmatpush3.msra.mxu1 %v788_v56  ;;  %1375 = vmatprep.subr.mxu0 %v1035_v50 }
 0x1b4   : > { %1349 = vmatprep.subr.mxu1 %v787_v57  ;;  %1376 = vmatpush3.msra.mxu0 %v1035_v50 }
 0x1b5   : > { %1350 = vmatpush3.msra.mxu1 %v787_v57  ;;  %1377 = vmatprep.subr.mxu0 %v1034_v51 }
 0x1b6   : > { %1357 = vmatprep.subr.msk.mxu1 %vm940_vm15, %v920_v32  ;;  %1378 = vmatpush3.msra.mxu0 %v1034_v51 }
 0x1b7   : > { %1379 = vmatprep.subr.mxu0 %v1033_v52 }
 0x1b8   : > { %1380 = vmatpush3.msra.mxu0 %v1033_v52 }
 0x26e   : > { %v1339_v59 = vpop.f32.mrf.mxu1 }
 0x26f   : > { %v762_v60 = vadd.f32 %v1339_v59, %v1218_v58 }
 0x270   : > { %v756_v61 = vpop.f32.mrf.mxu1 }
 0x271   : > { %v757_v62 = vadd.f32 %v1218_v58, %v756_v61  ;;  %v780_v63 = vmul.f32 0.01, %v762_v60  ;;  %vm776_vm10 = vcmp.gt.f32.partialorder %v762_v60, 0.0 }
 0x272   : > { %v1342_v0 = vpop.f32.mrf.mxu1 }
 0x273   : > { %vm775_vm11 = vcmp.gt.f32.partialorder %v757_v62, 0.0  ;;  %v779_v1 = vmul.f32 0.01, %v757_v62  ;;  %v772_v2 = vadd.f32 %v1342_v0, %v1218_v58  ;;  %v784_v7 = vsel %vm776_vm10, %v762_v60, %v780_v63 }
 0x274   : > { %v766_v3 = vpop.f32.mrf.mxu1 }
 0x275   : > { %v767_v4 = vadd.f32 %v1218_v58, %v766_v3  ;;  %v783_v6 = vsel %vm775_vm11, %v757_v62, %v779_v1  ;;  %v782_v8 = vmul.f32 0.01, %v772_v2  ;;  %vm778_vm12 = vcmp.gt.f32.partialorder %v772_v2, 0.0 }
 0x276   : > { %1351 = vmatprep.mubr.msk.f32.mxu1 %vm557_vm1, %v783_v6 }
 0x277   : > { %vm777_vm13 = vcmp.gt.f32.partialorder %v767_v4, 0.0  ;;  %v781_v12 = vmul.f32 0.01, %v767_v4  ;;  %1352 = vmatmul.mubr.msk.f32.vlgmr.msra.gmra.mxu1 %vm557_vm1, %v784_v7  ;;  %v786_v14 = vsel %vm778_vm12, %v772_v2, %v782_v8 }
 0x278   : > { %1358 = vmatpush3.msk.msra.mxu1 %vm940_vm15, %v920_v32 }
 0x279   : > { %v785_v13 = vsel %vm777_vm13, %v767_v4, %v781_v12 }
 0x27a   : > { %1354 = vmatprep.mubr.msk.f32.mxu1 %vm557_vm1, %v785_v13 }
 0x27b   : > { %1355 = vmatmul.mubr.msk.f32.gmra.mxu1 %vm557_vm1, %v786_v14  ;;  %vm1138_vm1 = vcmask 130048  }
 0x337   : > { %v1353_v15 = vpop.f32.mrf.mxu1 }
 0x338   : > { %v882_v18 = vadd.f32 %v1353_v15, %v1223_v16 }
 0x339   : > { %v876_v17 = vpop.f32.mrf.mxu1 }
 0x33a   : > { %v877_v19 = vadd.f32 %v1223_v16, %v876_v17  ;;  %v896_v26 = vand.u32 2147483647, %v882_v18 }
 0x33b   : > { %v1356_v20 = vpop.f32.mrf.mxu1 }
 0x33c   : > { %v895_v21 = vand.u32 2147483647, %v877_v19  ;;  %v892_v23 = vadd.f32 %v1356_v20, %v1223_v16  ;;  %v903_v29 = vsel %vm899_vm14, %v896_v26, 0.0 }
 0x33d   : > { %v886_v22 = vpop.f32.mrf.mxu1 }
 0x33e   : > { %v887_v24 = vadd.f32 %v1223_v16, %v886_v22  ;;  %v900_v25 = vsel %vm899_vm14, %v895_v21, 0.0  ;;  %v898_v30 = vand.u32 2147483647, %v892_v23 }
 0x33f   : > { %901 = vadd.xlane.f32.xlu0 %v900_v25 }
 0x340   : > { %v897_v27 = vand.u32 2147483647, %v887_v24  ;;  %v909_v31 = vsel %vm899_vm14, %v898_v30, 0.0 }
 0x342   : > { %v906_v28 = vsel %vm899_vm14, %v897_v27, 0.0 }
 0x343   : > { %907 = vadd.xlane.f32.xlu1 %v906_v28  ;;  %904 = vadd.xlane.f32.xlu0 %v903_v29 }
 0x347   : > { %910 = vadd.xlane.f32.xlu1 %v909_v31 }
 0x3c8   : > { %v902_v37 = vpop.xlane.xlu0 %901 }
 0x3c9   : > { %1395 = vrcp.f32 %v902_v37 }
 0x3cc   : > { %v908_v38 = vpop.xlane.xlu1 %907  ;;  %v905_v39 = vpop.xlane.xlu0 %904 }
 0x3cd   : > { %1397 = vrcp.f32 %v908_v38 }
 0x3ce   : > { %1399 = vrcp.f32 %v905_v39 }
 0x3d0   : > { %v911_v40 = vpop.xlane.xlu1 %910 }
 0x3d1   : > { %1401 = vrcp.f32 %v911_v40 }
 0x3d6   : > { %v1396_v41 = vpop.eup %1395 }
 0x3d7   : > { %v916_v42 = vmul.f32 %v1396_v41, %v877_v19 }
 0x3d9   : > { %1359 = vmatprep.mubr.msk.f32.mxu1 %vm899_vm14, %v916_v42 }
 0x3da   : > { %v1398_v43 = vpop.eup %1397 }
 0x3db   : > { %v1400_v44 = vpop.eup %1399  ;;  %v918_v45 = vmul.f32 %v1398_v43, %v887_v24 }
 0x3dc   : > { %v917_v46 = vmul.f32 %v1400_v44, %v882_v18 }
 0x3de   : > { %v1402_v47 = vpop.eup %1401  ;;  %1360 = vmatmul.mubr.msk.f32.vlgmr.msra.gmra.mxu1 %vm899_vm14, %v917_v46 }
 0x3df   : > { %1362 = vmatprep.mubr.msk.f32.mxu1 %vm899_vm14, %v918_v45  ;;  %v919_v48 = vmul.f32 %v1402_v47, %v892_v23 }
 0x3e2   : > { %1363 = vmatmul.mubr.msk.f32.gmra.mxu1 %vm899_vm14, %v919_v48 }
 0x49e   : > { %v1361_v54 = vpop.f32.mrf.mxu1 }
 0x49f   : > { %v1016_v55 = vadd.f32 %v1361_v54, %v1228_v53 }
 0x4a0   : > { %v1010_v56 = vpop.f32.mrf.mxu1 }
 0x4a1   : > { %v1011_v57 = vadd.f32 %v1228_v53, %v1010_v56  ;;  %v1030_v60 = vmul.f32 %v1016_v55, %v1520_v9 }
 0x4a2   : > { %v1364_v58 = vpop.f32.mrf.mxu1 }
 0x4a3   : > { %v1029_v59 = vmul.f32 %v1011_v57, %v1507_v5  ;;  %v1026_v61 = vadd.f32 %v1364_v58, %v1228_v53 }
 0x4a4   : > { %v1020_v62 = vpop.f32.mrf.mxu1 }
 0x4a5   : > { %v1021_v63 = vadd.f32 %v1228_v53, %v1020_v62  ;;  %1381 = vmatprep.mubr.msk.f32.mxu0 %vm436_vm0, %v1029_v59  ;;  %v1032_v1 = vmul.f32 %v1026_v61, %v1528_v11 }
 0x4a6   : > { %1382 = vmatmul.mubr.msk.f32.vlgmr.msra.gmra.mxu0 %vm436_vm0, %v1030_v60 }
 0x4a7   : > { %v1031_v0 = vmul.f32 %v1021_v63, %v1522_v10 }
 0x4a9   : > { %1384 = vmatprep.mubr.msk.f32.mxu0 %vm436_vm0, %v1031_v0 }
 0x4aa   : > { %1385 = vmatmul.mubr.msk.f32.gmra.mxu0 %vm436_vm0, %v1032_v1 }
 0x566   : > { %v1383_v5 = vpop.f32.mrf.mxu0 }
 0x567   : > { %1140 = vst.msk [vmem:[%s415_s20 + $0x8] sm:$0xff] %vm1138_vm1, %v1383_v5 }
 0x568   : > { %v1119_v9 = vpop.f32.mrf.mxu0 }
 0x569   : > { %1139 = vst.msk [vmem:[%s415_s20] sm:$0xff] %vm1138_vm1, %v1119_v9 }
 0x56a   : > { %v1386_v2 = vpop.f32.mrf.mxu0 }
 0x56b   : > { %1142 = vst.msk [vmem:[%s415_s20 + $0x18] sm:$0xff] %vm1138_vm1, %v1386_v2 }
 0x56c   : > { %v1129_v3 = vpop.f32.mrf.mxu0 }
 0x56d   : > { %1141 = vst.msk [vmem:[%s415_s20 + $0x10] sm:$0xff] %vm1138_vm1, %v1129_v3 }
 0x56e PF: > { %s22_s21 = sadd.s32 1, %s1409_s21  }
 0x56f   : > { %p19_p4 = scmp.ge.s32.totalorder %s22_s21, 6  }
 0x571   :  { %21 = sbr.rel (!%p19_p4) target bundleno = 1 (0x1), region = 98 }

</bundles_post_ra>
